<compile_context>
chip_gen: v6e
topology: v6e:2x2x1
jax: 0.10.0
libtpu: 0.0.40
codegen_flags: <defaults>
</compile_context>

<pallas_src>
import functools

import jax
import jax.numpy as jnp
from jax import lax
from jax.experimental import pallas as pl
from jax.experimental.pallas import tpu as pltpu


def _norm_kernel(x_ref, xn_ref):
    """Pass 0: xn = F.normalize(x, dim=1) stored in bf16."""
    x = x_ref[...]                                              # (T0, C) f32
    sq = jnp.sum(x * x, axis=1, keepdims=True)
    # rsqrt(max(|x|^2, 1e-24)) == 1 / max(|x|, 1e-12)  (F.normalize eps)
    xn_ref[...] = (x * lax.rsqrt(jnp.maximum(sq, 1e-24))).astype(jnp.bfloat16)


def _graph_kernel(xn_i_ref, xn_k_ref, x_i_ref, w1_ref, dinv_ref, z1_ref,
                  deg_acc, *, threshold):
    """Pass 1: degree of the thresholded graph -> D^{-1/2}; z1 = D^{-1/2}(X W1)."""
    k = pl.program_id(1)
    nk = pl.num_programs(1)

    @pl.when(k == 0)
    def _():
        deg_acc[...] = jnp.zeros_like(deg_acc)

    # bf16 x bf16 -> f32 cosine-similarity tile (contraction, no explicit .T).
    sim = lax.dot_general(xn_i_ref[...], xn_k_ref[...],
                          (((1,), (1,)), ((), ())),
                          preferred_element_type=jnp.float32)   # (TM, TK)
    # Degree: sum of the thresholded mask directly (compare + select + reduce);
    # no second full-tile adjacency copy is materialized here.
    deg_acc[...] += jnp.sum((sim > threshold).astype(jnp.float32),
                            axis=1, keepdims=True)

    @pl.when(k == nk - 1)
    def _():
        deg = deg_acc[...]
        dinv = jnp.where(deg > 0.0, lax.rsqrt(deg), 0.0)        # (TM, 1)
        dinv_ref[...] = dinv
        xw1 = jnp.dot(x_i_ref[...].astype(jnp.bfloat16), w1_ref[...],
                      preferred_element_type=jnp.float32)       # (TM, C)
        z1_ref[...] = (dinv * xw1).astype(jnp.bfloat16)


def _layer1_kernel(xn_i_ref, xn_k_ref, z1_k_ref, dinv_i_ref, b1_ref, w2_ref,
                   z2_ref, acc, *, threshold):
    """Pass 2: h1 = relu(A_hat @ (X W1) + b1); emit z2 = D^{-1/2} (h1 @ W2)."""
    k = pl.program_id(1)
    nk = pl.num_programs(1)

    @pl.when(k == 0)
    def _():
        acc[...] = jnp.zeros_like(acc)

    sim = lax.dot_general(xn_i_ref[...], xn_k_ref[...],
                          (((1,), (1,)), ((), ())),
                          preferred_element_type=jnp.float32)   # (TM, TK)
    adj = (sim > threshold).astype(jnp.bfloat16)                # exact 0/1 in bf16
    acc[...] += jnp.dot(adj, z1_k_ref[...],
                        preferred_element_type=jnp.float32)     # (TM, C)

    @pl.when(k == nk - 1)
    def _():
        dinv_i = dinv_i_ref[...]                                # (TM, 1)
        h1 = jnp.maximum(dinv_i * acc[...] + b1_ref[...], 0.0)  # ReLU
        h1w2 = jnp.dot(h1.astype(jnp.bfloat16), w2_ref[...],
                       preferred_element_type=jnp.float32)
        z2_ref[...] = (dinv_i * h1w2).astype(jnp.bfloat16)


def _layer2_kernel(xn_i_ref, xn_k_ref, z2_k_ref, dinv_i_ref, b2_ref, x_i_ref,
                   o_ref, acc, *, threshold, lam):
    """Pass 3: h2 = A_hat @ (h1 W2) + b2; out = x + lam * h2."""
    k = pl.program_id(1)
    nk = pl.num_programs(1)

    @pl.when(k == 0)
    def _():
        acc[...] = jnp.zeros_like(acc)

    sim = lax.dot_general(xn_i_ref[...], xn_k_ref[...],
                          (((1,), (1,)), ((), ())),
                          preferred_element_type=jnp.float32)
    adj = (sim > threshold).astype(jnp.bfloat16)
    acc[...] += jnp.dot(adj, z2_k_ref[...],
                        preferred_element_type=jnp.float32)

    @pl.when(k == nk - 1)
    def _():
        h2 = dinv_i_ref[...] * acc[...] + b2_ref[...]
        o_ref[...] = x_i_ref[...] + lam * h2


def _pick_tiles(m):
    """Asymmetric (row, column) tiles for the M x M graph passes."""
    tk = 256 if m > 128 else 128
    # Large row tile for column-stream reuse, but keep >= 2 row blocks
    # (v7x megacore) and cap TM at 1024 (TM*TK = 256K elems => f32 sim tile
    # 1 MiB + bf16 adj 0.5 MiB, comfortably VMEM-safe on v7x).
    tm = 1024
    while tm > 128 and -(-m // tm) < 2:
        tm //= 2
    return tm, tk


def gcn_forward(x_nhwc, w1, b1, w2, b2, *, threshold=0.85, lambda_weight=0.5):
    """x_nhwc: (N, H, W, C) float32.  Returns the same shape."""
    N, H, W, C = x_nhwc.shape
    M = N * H * W
    x_flat = x_nhwc.reshape(M, C).astype(jnp.float32)

    # Zero-padded rows have zero norm -> zero similarity everywhere, so they
    # stay edge-free only while the threshold is positive.
    assert threshold > 0.0, "zero-row padding requires a positive threshold"
    # TODO(synk): a real all-zero feature row would get +1 self-loop from
    # PyG's add_remaining_self_loops; not reproduced (never occurs here).

    tm, tk = _pick_tiles(M)
    mult = max(tm, tk)                      # both powers of two -> lcm == max
    m_pad = -(-M // mult) * mult
    if m_pad != M:
        x_flat = jnp.pad(x_flat, ((0, m_pad - M), (0, 0)))
    gr, gc = m_pad // tm, m_pad // tk

    w1_bf = w1.astype(jnp.bfloat16)
    w2_bf = w2.astype(jnp.bfloat16)
    b1_2d = b1.reshape(1, C).astype(jnp.float32)
    b2_2d = b2.reshape(1, C).astype(jnp.float32)

    cparams = pltpu.CompilerParams(
        dimension_semantics=("parallel", "arbitrary"),
        vmem_limit_bytes=48 * 1024 * 1024)   # headroom for larger tiles; <=48MiB
                                             # keeps margin on v7x's 64 MiB VMEM

    # Row-resident blocks (read once per row tile, held across the reduction).
    row_spec = pl.BlockSpec((tm, C), lambda i, k: (i, 0))
    # Column streams: small bf16 tiles re-read once per row tile -> 3 buffers.
    col_spec = pl.BlockSpec((tk, C), lambda i, k: (k, 0),
                            pipeline_mode=pl.Buffered(3))
    vec_spec = pl.BlockSpec((tm, 1), lambda i, k: (i, 0))
    wt_spec = pl.BlockSpec((C, C), lambda i, k: (0, 0))
    bias_spec = pl.BlockSpec((1, C), lambda i, k: (0, 0))

    # --- pass 0: row-normalized features in bf16 (O(M*C), trivially cheap) --
    xn = pl.pallas_call(
        _norm_kernel,
        grid=(gr,),
        in_specs=[pl.BlockSpec((tm, C), lambda i: (i, 0))],
        out_specs=pl.BlockSpec((tm, C), lambda i: (i, 0)),
        out_shape=jax.ShapeDtypeStruct((m_pad, C), jnp.bfloat16),
        compiler_params=pltpu.CompilerParams(
            dimension_semantics=("parallel",)),
    )(x_flat)

    # --- pass 1: degree of thresholded graph -> D^{-1/2}; z1 = dinv*(X W1) --
    dinv, z1 = pl.pallas_call(
        functools.partial(_graph_kernel, threshold=float(threshold)),
        grid=(gr, gc),
        in_specs=[row_spec, col_spec, row_spec, wt_spec],
        out_specs=[vec_spec, row_spec],
        out_shape=[
            jax.ShapeDtypeStruct((m_pad, 1), jnp.float32),
            jax.ShapeDtypeStruct((m_pad, C), jnp.bfloat16),
        ],
        scratch_shapes=[pltpu.VMEM((tm, 1), jnp.float32)],
        compiler_params=cparams,
    )(xn, xn, x_flat, w1_bf)

    # --- pass 2: first GCN layer + ReLU, fused layer-2 feature transform ----
    z2 = pl.pallas_call(
        functools.partial(_layer1_kernel, threshold=float(threshold)),
        grid=(gr, gc),
        in_specs=[row_spec, col_spec, col_spec, vec_spec, bias_spec, wt_spec],
        out_specs=row_spec,
        out_shape=jax.ShapeDtypeStruct((m_pad, C), jnp.bfloat16),
        scratch_shapes=[pltpu.VMEM((tm, C), jnp.float32)],
        compiler_params=cparams,
    )(xn, xn, z1, dinv, b1_2d, w2_bf)

    # --- pass 3: second GCN layer + residual fuse ----------------------------
    out = pl.pallas_call(
        functools.partial(_layer2_kernel, threshold=float(threshold),
                          lam=float(lambda_weight)),
        grid=(gr, gc),
        in_specs=[row_spec, col_spec, col_spec, vec_spec, bias_spec, row_spec],
        out_specs=row_spec,
        out_shape=jax.ShapeDtypeStruct((m_pad, C), jnp.float32),
        scratch_shapes=[pltpu.VMEM((tm, C), jnp.float32)],
        compiler_params=cparams,
    )(xn, xn, z2, dinv, b2_2d, x_flat)

    return out[:M].reshape(N, H, W, C)


if __name__ == "__main__":
    # Small shapes consistent with the module (NHWC, dim = C = 64).
    # M = N*H*W = 512 nodes -> tm = tk = 256, grid = (2, 2): exercises the
    # parallel row axis, the reduction accumulation, and all four passes.
    N, H, W, C = 2, 16, 16, 64
    key = jax.random.PRNGKey(0)
    kx, k1, k2 = jax.random.split(key, 3)

    x = jax.random.normal(kx, (N, H, W, C), dtype=jnp.float32)

    # Deterministic parameter init (glorot-ish scale); GCNConv bias -> zeros.
    scale = 1.0 / jnp.sqrt(jnp.float32(C))
    w1 = jax.random.normal(k1, (C, C), dtype=jnp.float32) * scale
    b1 = jnp.zeros((C,), dtype=jnp.float32)
    w2 = jax.random.normal(k2, (C, C), dtype=jnp.float32) * scale
    b2 = jnp.zeros((C,), dtype=jnp.float32)

    out = gcn_forward(x, w1, b1, w2, b2, threshold=0.85, lambda_weight=0.5)
    jax.block_until_ready(out)
    assert out.shape == (N, H, W, C)
    assert bool(jnp.all(jnp.isfinite(out)))
    print("KERNEL_OK")
</pallas_src>

<mosaic_0001>
module attributes {stable_mosaic.version = 11 : i64} {
  func.func @_norm_kernel(%arg0: i32, %arg1: memref<256x64xf32, #tpu.memory_space<vmem>>, %arg2: memref<256x64xbf16, #tpu.memory_space<vmem>>) attributes {dimension_semantics = [#tpu.dimension_semantics<parallel>], iteration_bounds = array<i64: 2>, scalar_prefetch = 0 : i64, scratch_operands = 0 : i64, tpu.core_type = #tpu.core_type<tc>, window_params = [{transform_indices = @transform_0, window_bounds = array<i64: 256, 64>}, {transform_indices = @transform_1, window_bounds = array<i64: 256, 64>}]} {
    %c0 = arith.constant 0 : index
    %c0_0 = arith.constant 0 : index
    %0 = vector.load %arg1[%c0, %c0_0] : memref<256x64xf32, #tpu.memory_space<vmem>>, vector<256x64xf32>
    %1 = arith.mulf %0, %0 : vector<256x64xf32>
    %cst = arith.constant dense<0.000000e+00> : vector<256xf32>
    %2 = vector.multi_reduction <add>, %1, %cst [1] : vector<256x64xf32> to vector<256xf32>
    %3 = vector.shape_cast %2 : vector<256xf32> to vector<256x1xf32>
    %cst_1 = arith.constant 1.000000e-24 : f32
    %4 = vector.broadcast %cst_1 : f32 to vector<256x1xf32>
    %5 = arith.maximumf %3, %4 : vector<256x1xf32>
    %6 = math.rsqrt %5 : vector<256x1xf32>
    %7 = vector.broadcast %6 : vector<256x1xf32> to vector<256x64xf32>
    %8 = arith.mulf %0, %7 : vector<256x64xf32>
    %9 = arith.truncf %8 : vector<256x64xf32> to vector<256x64xbf16>
    %c0_2 = arith.constant 0 : index
    %c0_3 = arith.constant 0 : index
    %10 = vector.load %arg2[%c0_2, %c0_3] : memref<256x64xbf16, #tpu.memory_space<vmem>>, vector<256x64xbf16>
    tpu.vector_store %arg2[%c0_2, %c0_3], %9 {strides = array<i32>} : memref<256x64xbf16, #tpu.memory_space<vmem>>, vector<256x64xbf16>,
    return
  }
  func.func @transform_0(%arg0: i32) -> (i32, i32) {
    %c0_i32 = arith.constant 0 : i32
    %c0_i32_0 = arith.constant 0 : i32
    return %arg0, %c0_i32 : i32, i32
  }
  func.func @transform_1(%arg0: i32) -> (i32, i32) {
    %c0_i32 = arith.constant 0 : i32
    %c0_i32_0 = arith.constant 0 : i32
    return %arg0, %c0_i32 : i32, i32
  }
}

</mosaic_0001>

<bundles_post_ra>
// kernel: tpu_custom_call.1
= control target key start
LH: loop header
LB: loop body
LE: loop exit
PB: predicated region body
PF: predicated region fallthrough
CT: control target
= control target key end

     0   :  { %s759_s6 = smov 0   ;;  %s1072_s0 = inlined_call_operand.vmem [shape: f32[512,64], index: 0, kind: input, shape index: {}]   ;;  %s1073_s1 = inlined_call_operand.vmem [shape: bf16[512,64], index: 1, kind: output, shape index: {}]  }
   0x1 LB: > { %s594_s7 = sadd.s32 4294967295, %s747_s6   ;;  %p598_p0 = scmp.ge.s32.totalorder %s747_s6, 1  ;;  %s747_s6 = sphi %s759_s6, %s11_s6  }
   0x2   : > { %p88_p1 = scmp.lt.s32.totalorder %s747_s6, 3 }
   0x4   : > { %p89_p2 = pnand %p598_p0, %p88_p1 }
   0x5   : > { %s599_s8 = sshll.u32 (!%p89_p2), %s594_s7, 5 }
   0x6   : > { %92 = sbr.rel (%p89_p2) target bundleno = 238 (0xee), region = 24  ;;  %p109_p3 = scmp.lt.s32.totalorder (!%p89_p2), %s599_s8, 63 }
   0xb   : > { %s1075_s8 = smov (!%p109_p3, %s599_s8), 63  ;;  %vm184_vm0 = vcmask 523264   ;;  %vm505_vm1 = vcmask 519168  }
   0xc   : > { %s600_s9 = sshll.u32 %s1075_s8, 3  ;;  %s602_s13 = sshll.u32 %s1075_s8, 2 }
   0xd   : > { %s773_s12 = scalar_lea.vmem %s1072_s0, %s600_s9  ;;  %s972_s16 = scalar_lea.vmem %s1073_s1, %s602_s13 }
   0xe   : > { %v776_v0 = vld [vmem:[%s773_s12 + $0x10] sm:$0xff]  ;;  %v779_v1 = vld [vmem:[%s773_s12] sm:$0xff]  ;;  %v782_v2 = vld [vmem:[%s773_s12 + $0x18] sm:$0xff] }
   0xf   : > { %v154_v3 = vmul.f32 %v776_v0, %v776_v0  ;;  %v152_v4 = vmul.f32 %v779_v1, %v779_v1  ;;  %v155_v5 = vmul.f32 %v782_v2, %v782_v2  ;;  %v791_v6 = vld [vmem:[%s773_s12 + $0x8] sm:$0xff]  ;;  %v799_v9 = vld [vmem:[%s773_s12 + $0x20] sm:$0xff]  ;;  %v810_v16 = vld [vmem:[%s773_s12 + $0x38] sm:$0xff] }
  0x10   : > { %v153_v7 = vmul.f32 %v791_v6, %v791_v6  ;;  %v796_v8 = vld [vmem:[%s773_s12 + $0x28] sm:$0xff]  ;;  %v156_v15 = vmul.f32 %v799_v9, %v799_v9  ;;  %v813_v17 = vld [vmem:[%s773_s12 + $0x30] sm:$0xff]  ;;  %v159_v20 = vmul.f32 %v810_v16, %v810_v16  ;;  %v825_v23 = vld [vmem:[%s773_s12 + $0x40] sm:$0xff] }
  0x11   : > { %v191_v10 = vsel %vm184_vm0, %v154_v3, 0.0  ;;  %v185_v11 = vsel %vm184_vm0, %v152_v4, 0.0  ;;  %v194_v12 = vsel %vm184_vm0, %v155_v5, 0.0  ;;  %v157_v14 = vmul.f32 %v796_v8, %v796_v8  ;;  %v822_v22 = vld [vmem:[%s773_s12 + $0x48] sm:$0xff]  ;;  %v834_v28 = vld [vmem:[%s773_s12 + $0x58] sm:$0xff]  ;;  %v837_v29 = vld [vmem:[%s773_s12 + $0x50] sm:$0xff] }
  0x12   : > { %192 = vadd.xlane.f32.xlu1 %v191_v10  ;;  %186 = vadd.xlane.f32.xlu0 %v185_v11  ;;  %v188_v13 = vsel %vm184_vm0, %v153_v7, 0.0  ;;  %v197_v19 = vsel %vm184_vm0, %v156_v15, 0.0  ;;  %v158_v21 = vmul.f32 %v813_v17, %v813_v17  ;;  %v206_v24 = vsel %vm184_vm0, %v159_v20, 0.0  ;;  %v846_v34 = vld [vmem:[%s773_s12 + $0x68] sm:$0xff]  ;;  %v849_v35 = vld [vmem:[%s773_s12 + $0x60] sm:$0xff]  ;;  %v858_v40 = vld [vmem:[%s773_s12 + $0x78] sm:$0xff] }
  0x13   : > { %v200_v18 = vsel %vm184_vm0, %v157_v14, 0.0  ;;  %v161_v26 = vmul.f32 %v822_v22, %v822_v22  ;;  %v160_v27 = vmul.f32 %v825_v23, %v825_v23  ;;  %v163_v32 = vmul.f32 %v834_v28, %v834_v28  ;;  %v861_v41 = vld [vmem:[%s773_s12 + $0x70] sm:$0xff]  ;;  %v870_v46 = vld [vmem:[%s773_s12 + $0x88] sm:$0xff]  ;;  %v873_v47 = vld [vmem:[%s773_s12 + $0x80] sm:$0xff] }
  0x14   : > { %v203_v25 = vsel %vm184_vm0, %v158_v21, 0.0  ;;  %v162_v33 = vmul.f32 %v837_v29, %v837_v29  ;;  %v165_v38 = vmul.f32 %v846_v34, %v846_v34  ;;  %v164_v39 = vmul.f32 %v849_v35, %v849_v35  ;;  %v882_v52 = vld [vmem:[%s773_s12 + $0x98] sm:$0xff]  ;;  %v885_v53 = vld [vmem:[%s773_s12 + $0x90] sm:$0xff]  ;;  %v894_v58 = vld [vmem:[%s773_s12 + $0xa8] sm:$0xff] }
  0x15   : > { %v212_v30 = vsel %vm184_vm0, %v161_v26, 0.0  ;;  %v209_v31 = vsel %vm184_vm0, %v160_v27, 0.0  ;;  %v218_v36 = vsel %vm184_vm0, %v163_v32, 0.0  ;;  %v167_v44 = vmul.f32 %v858_v40, %v858_v40  ;;  %v897_v59 = vld [vmem:[%s773_s12 + $0xa0] sm:$0xff]  ;;  %v906_v3 = vld [vmem:[%s773_s12 + $0xb8] sm:$0xff]  ;;  %v909_v4 = vld [vmem:[%s773_s12 + $0xb0] sm:$0xff] }
  0x16   : > { %195 = vadd.xlane.f32.xlu1 %v194_v12  ;;  %189 = vadd.xlane.f32.xlu0 %v188_v13  ;;  %v215_v37 = vsel %vm184_vm0, %v162_v33, 0.0  ;;  %v224_v42 = vsel %vm184_vm0, %v165_v38, 0.0  ;;  %v221_v43 = vsel %vm184_vm0, %v164_v39, 0.0  ;;  %v166_v45 = vmul.f32 %v861_v41, %v861_v41  ;;  %v918_v12 = vld [vmem:[%s773_s12 + $0xc8] sm:$0xff]  ;;  %v921_v13 = vld [vmem:[%s773_s12 + $0xc0] sm:$0xff]  ;;  %v930_v20 = vld [vmem:[%s773_s12 + $0xd8] sm:$0xff] }
  0x17   : > { %v230_v48 = vsel %vm184_vm0, %v167_v44, 0.0  ;;  %v169_v50 = vmul.f32 %v870_v46, %v870_v46  ;;  %v168_v51 = vmul.f32 %v873_v47, %v873_v47  ;;  %v171_v56 = vmul.f32 %v882_v52, %v882_v52  ;;  %v933_v21 = vld [vmem:[%s773_s12 + $0xd0] sm:$0xff]  ;;  %v954_v38 = vld [vmem:[%s773_s12 + $0xf8] sm:$0xff] }
  0x18   : > { %v227_v49 = vsel %vm184_vm0, %v166_v45, 0.0  ;;  %v170_v57 = vmul.f32 %v885_v53, %v885_v53  ;;  %v173_v62 = vmul.f32 %v894_v58, %v894_v58  ;;  %v172_v63 = vmul.f32 %v897_v59, %v897_v59  ;;  %v957_v39 = vld [vmem:[%s773_s12 + $0xf0] sm:$0xff] }
  0x19   : > { %v236_v54 = vsel %vm184_vm0, %v169_v50, 0.0  ;;  %v233_v55 = vsel %vm184_vm0, %v168_v51, 0.0  ;;  %v242_v60 = vsel %vm184_vm0, %v171_v56, 0.0  ;;  %v175_v10 = vmul.f32 %v906_v3, %v906_v3 }
  0x1a   : > { %201 = vadd.xlane.f32.xlu1 %v200_v18  ;;  %198 = vadd.xlane.f32.xlu0 %v197_v19  ;;  %v239_v61 = vsel %vm184_vm0, %v170_v57, 0.0  ;;  %v248_v5 = vsel %vm184_vm0, %v173_v62, 0.0  ;;  %v245_v7 = vsel %vm184_vm0, %v172_v63, 0.0  ;;  %v174_v11 = vmul.f32 %v909_v4, %v909_v4 }
  0x1b   : > { %v254_v14 = vsel %vm184_vm0, %v175_v10, 0.0  ;;  %v177_v18 = vmul.f32 %v918_v12, %v918_v12  ;;  %v176_v19 = vmul.f32 %v921_v13, %v921_v13  ;;  %v179_v26 = vmul.f32 %v930_v20, %v930_v20 }
  0x1c   : > { %v251_v15 = vsel %vm184_vm0, %v174_v11, 0.0  ;;  %v178_v27 = vmul.f32 %v933_v21, %v933_v21  ;;  %v183_v44 = vmul.f32 %v954_v38, %v954_v38  ;;  %v182_v45 = vmul.f32 %v957_v39, %v957_v39 }
  0x1d   : > { %v266_v32 = vsel %vm184_vm0, %v179_v26, 0.0 }
  0x1e   : > { %207 = vadd.xlane.f32.xlu1 %v206_v24  ;;  %204 = vadd.xlane.f32.xlu0 %v203_v25  ;;  %v260_v24 = vsel %vm184_vm0, %v177_v18, 0.0  ;;  %v257_v25 = vsel %vm184_vm0, %v176_v19, 0.0  ;;  %v263_v33 = vsel %vm184_vm0, %v178_v27, 0.0 }
  0x22   : > { %213 = vadd.xlane.f32.xlu1 %v212_v30  ;;  %210 = vadd.xlane.f32.xlu0 %v209_v31  ;;  %v942_v30 = vld [vmem:[%s773_s12 + $0xe8] sm:$0xff]  ;;  %v945_v31 = vld [vmem:[%s773_s12 + $0xe0] sm:$0xff] }
  0x26   : > { %219 = vadd.xlane.f32.xlu1 %v218_v36  ;;  %216 = vadd.xlane.f32.xlu0 %v215_v37  ;;  %v181_v36 = vmul.f32 %v942_v30, %v942_v30  ;;  %v180_v37 = vmul.f32 %v945_v31, %v945_v31 }
  0x2a   : > { %225 = vadd.xlane.f32.xlu1 %v224_v42  ;;  %222 = vadd.xlane.f32.xlu0 %v221_v43  ;;  %v272_v42 = vsel %vm184_vm0, %v181_v36, 0.0  ;;  %v269_v43 = vsel %vm184_vm0, %v180_v37, 0.0 }
  0x2e   : > { %231 = vadd.xlane.f32.xlu1 %v230_v48  ;;  %228 = vadd.xlane.f32.xlu0 %v227_v49  ;;  %v278_v48 = vsel %vm184_vm0, %v183_v44, 0.0  ;;  %v275_v49 = vsel %vm184_vm0, %v182_v45, 0.0 }
  0x32   : > { %237 = vadd.xlane.f32.xlu1 %v236_v54  ;;  %234 = vadd.xlane.f32.xlu0 %v233_v55 }
  0x36   : > { %243 = vadd.xlane.f32.xlu1 %v242_v60  ;;  %240 = vadd.xlane.f32.xlu0 %v239_v61 }
  0x3a   : > { %249 = vadd.xlane.f32.xlu1 %v248_v5  ;;  %246 = vadd.xlane.f32.xlu0 %v245_v7 }
  0x3e   : > { %255 = vadd.xlane.f32.xlu1 %v254_v14  ;;  %252 = vadd.xlane.f32.xlu0 %v251_v15 }
  0x42   : > { %261 = vadd.xlane.f32.xlu1 %v260_v24  ;;  %258 = vadd.xlane.f32.xlu0 %v257_v25 }
  0x46   : > { %267 = vadd.xlane.f32.xlu1 %v266_v32  ;;  %264 = vadd.xlane.f32.xlu0 %v263_v33 }
  0x4a   : > { %273 = vadd.xlane.f32.xlu1 %v272_v42  ;;  %270 = vadd.xlane.f32.xlu0 %v269_v43 }
  0x4e   : > { %279 = vadd.xlane.f32.xlu1 %v278_v48  ;;  %276 = vadd.xlane.f32.xlu0 %v275_v49 }
  0x9b   : > { %v193_v50 = vpop.xlane.xlu1 %192  ;;  %v187_v51 = vpop.xlane.xlu0 %186 }
  0x9c   : > { %v283_v54 = vmax.f32 %v193_v50, 1e-24  ;;  %v281_v55 = vmax.f32 %v187_v51, 1e-24 }
  0x9e   : > { %677 = vrsqrt.f32 %v283_v54 }
  0x9f   : > { %679 = vrsqrt.f32 %v281_v55  ;;  %v196_v56 = vpop.xlane.xlu1 %195  ;;  %v190_v57 = vpop.xlane.xlu0 %189 }
  0xa0   : > { %v284_v60 = vmax.f32 %v196_v56, 1e-24  ;;  %v282_v61 = vmax.f32 %v190_v57, 1e-24 }
  0xa2   : > { %681 = vrsqrt.f32 %v284_v60 }
  0xa3   : > { %683 = vrsqrt.f32 %v282_v61  ;;  %v202_v62 = vpop.xlane.xlu1 %201  ;;  %v199_v63 = vpop.xlane.xlu0 %198 }
  0xa4   : > { %v286_v5 = vmax.f32 %v202_v62, 1e-24  ;;  %v285_v7 = vmax.f32 %v199_v63, 1e-24 }
  0xa6   : > { %685 = vrsqrt.f32 %v286_v5 }
  0xa7   : > { %687 = vrsqrt.f32 %v285_v7  ;;  %v208_v10 = vpop.xlane.xlu1 %207  ;;  %v205_v11 = vpop.xlane.xlu0 %204 }
  0xa8   : > { %v288_v14 = vmax.f32 %v208_v10, 1e-24  ;;  %v287_v15 = vmax.f32 %v205_v11, 1e-24 }
  0xaa   : > { %689 = vrsqrt.f32 %v288_v14 }
  0xab   : > { %v678_v18 = vpop.eup %677  ;;  %691 = vrsqrt.f32 %v287_v15  ;;  %v214_v19 = vpop.xlane.xlu1 %213 }
  0xac   : > { %v211_v24 = vpop.xlane.xlu0 %210  ;;  %v680_v25 = vpop.eup %679  ;;  %v347_v26 = vmul.f32 %v678_v18, %v776_v0  ;;  %v290_v27 = vmax.f32 %v214_v19, 1e-24 }
  0xad   : > { %v289_v32 = vmax.f32 %v211_v24, 1e-24  ;;  %v345_v33 = vmul.f32 %v680_v25, %v779_v1 }
  0xae   : > { %v639_v36 = vpack.c.bf16 %v347_v26, %v347_v26  ;;  %693 = vrsqrt.f32 %v290_v27 }
  0xaf   : > { %v682_v37 = vpop.eup %681  ;;  %v637_v42 = vpack.c.bf16 %v345_v33, %v345_v33  ;;  %695 = vrsqrt.f32 %v289_v32  ;;  %v220_v43 = vpop.xlane.xlu1 %219 }
  0xb0   : > { %v217_v44 = vpop.xlane.xlu0 %216  ;;  %v684_v0 = vpop.eup %683  ;;  %508 = vst.msk [vmem:[%s972_s16 + $0x8] sm:$0xf] %vm505_vm1, %v639_v36  ;;  %v348_v45 = vmul.f32 %v682_v37, %v782_v2  ;;  %v292_v48 = vmax.f32 %v220_v43, 1e-24 }
  0xb1   : > { %v291_v49 = vmax.f32 %v217_v44, 1e-24  ;;  %506 = vst.msk [vmem:[%s972_s16] sm:$0xf] %vm505_vm1, %v637_v42  ;;  %v346_v1 = vmul.f32 %v684_v0, %v791_v6 }
  0xb2   : > { %v640_v50 = vpack.c.bf16 %v348_v45, %v348_v45  ;;  %697 = vrsqrt.f32 %v292_v48 }
  0xb3   : > { %v686_v51 = vpop.eup %685  ;;  %v638_v54 = vpack.c.bf16 %v346_v1, %v346_v1  ;;  %699 = vrsqrt.f32 %v291_v49  ;;  %v226_v55 = vpop.xlane.xlu1 %225 }
  0xb4   : > { %v223_v56 = vpop.xlane.xlu0 %222  ;;  %v688_v57 = vpop.eup %687  ;;  %509 = vst.msk [vmem:[%s972_s16 + $0xc] sm:$0xf] %vm505_vm1, %v640_v50  ;;  %v350_v2 = vmul.f32 %v686_v51, %v796_v8  ;;  %v294_v60 = vmax.f32 %v226_v55, 1e-24 }
  0xb5   : > { %v293_v61 = vmax.f32 %v223_v56, 1e-24  ;;  %507 = vst.msk [vmem:[%s972_s16 + $0x4] sm:$0xf] %vm505_vm1, %v638_v54  ;;  %v349_v6 = vmul.f32 %v688_v57, %v799_v9 }
  0xb6   : > { %v642_v62 = vpack.c.bf16 %v350_v2, %v350_v2  ;;  %701 = vrsqrt.f32 %v294_v60 }
  0xb7   : > { %v690_v63 = vpop.eup %689  ;;  %v641_v5 = vpack.c.bf16 %v349_v6, %v349_v6  ;;  %703 = vrsqrt.f32 %v293_v61  ;;  %v232_v7 = vpop.xlane.xlu1 %231 }
  0xb8   : > { %v229_v10 = vpop.xlane.xlu0 %228  ;;  %v692_v11 = vpop.eup %691  ;;  %511 = vst.msk [vmem:[%s972_s16 + $0x14] sm:$0xf] %vm505_vm1, %v642_v62  ;;  %v352_v8 = vmul.f32 %v690_v63, %v810_v16  ;;  %v296_v14 = vmax.f32 %v232_v7, 1e-24 }
  0xb9   : > { %v295_v15 = vmax.f32 %v229_v10, 1e-24  ;;  %510 = vst.msk [vmem:[%s972_s16 + $0x10] sm:$0xf] %vm505_vm1, %v641_v5  ;;  %v351_v9 = vmul.f32 %v692_v11, %v813_v17 }
  0xba   : > { %v644_v18 = vpack.c.bf16 %v352_v8, %v352_v8  ;;  %705 = vrsqrt.f32 %v296_v14 }
  0xbb   : > { %v694_v19 = vpop.eup %693  ;;  %v643_v24 = vpack.c.bf16 %v351_v9, %v351_v9  ;;  %707 = vrsqrt.f32 %v295_v15  ;;  %v238_v25 = vpop.xlane.xlu1 %237 }
  0xbc   : > { %v235_v26 = vpop.xlane.xlu0 %234  ;;  %v696_v27 = vpop.eup %695  ;;  %513 = vst.msk [vmem:[%s972_s16 + $0x1c] sm:$0xf] %vm505_vm1, %v644_v18  ;;  %v354_v16 = vmul.f32 %v694_v19, %v822_v22  ;;  %v298_v32 = vmax.f32 %v238_v25, 1e-24 }
  0xbd   : > { %v297_v33 = vmax.f32 %v235_v26, 1e-24  ;;  %512 = vst.msk [vmem:[%s972_s16 + $0x18] sm:$0xf] %vm505_vm1, %v643_v24  ;;  %v353_v17 = vmul.f32 %v696_v27, %v825_v23 }
  0xbe   : > { %v646_v36 = vpack.c.bf16 %v354_v16, %v354_v16  ;;  %709 = vrsqrt.f32 %v298_v32 }
  0xbf   : > { %v698_v37 = vpop.eup %697  ;;  %v645_v42 = vpack.c.bf16 %v353_v17, %v353_v17  ;;  %711 = vrsqrt.f32 %v297_v33  ;;  %v244_v43 = vpop.xlane.xlu1 %243 }
  0xc0   : > { %v241_v44 = vpop.xlane.xlu0 %240  ;;  %v700_v0 = vpop.eup %699  ;;  %515 = vst.msk [vmem:[%s972_s16 + $0x24] sm:$0xf] %vm505_vm1, %v646_v36  ;;  %v356_v22 = vmul.f32 %v698_v37, %v834_v28  ;;  %v300_v45 = vmax.f32 %v244_v43, 1e-24 }
  0xc1   : > { %v299_v48 = vmax.f32 %v241_v44, 1e-24  ;;  %514 = vst.msk [vmem:[%s972_s16 + $0x20] sm:$0xf] %vm505_vm1, %v645_v42  ;;  %v355_v23 = vmul.f32 %v700_v0, %v837_v29 }
  0xc2   : > { %v648_v49 = vpack.c.bf16 %v356_v22, %v356_v22  ;;  %713 = vrsqrt.f32 %v300_v45 }
  0xc3   : > { %v702_v1 = vpop.eup %701  ;;  %v647_v50 = vpack.c.bf16 %v355_v23, %v355_v23  ;;  %715 = vrsqrt.f32 %v299_v48  ;;  %v250_v51 = vpop.xlane.xlu1 %249 }
  0xc4   : > { %v247_v54 = vpop.xlane.xlu0 %246  ;;  %v704_v55 = vpop.eup %703  ;;  %517 = vst.msk [vmem:[%s972_s16 + $0x2c] sm:$0xf] %vm505_vm1, %v648_v49  ;;  %v358_v28 = vmul.f32 %v702_v1, %v846_v34  ;;  %v302_v56 = vmax.f32 %v250_v51, 1e-24 }
  0xc5   : > { %v301_v57 = vmax.f32 %v247_v54, 1e-24  ;;  %516 = vst.msk [vmem:[%s972_s16 + $0x28] sm:$0xf] %vm505_vm1, %v647_v50  ;;  %v357_v29 = vmul.f32 %v704_v55, %v849_v35 }
  0xc6   : > { %v650_v2 = vpack.c.bf16 %v358_v28, %v358_v28  ;;  %717 = vrsqrt.f32 %v302_v56 }
  0xc7   : > { %v706_v60 = vpop.eup %705  ;;  %v649_v61 = vpack.c.bf16 %v357_v29, %v357_v29  ;;  %719 = vrsqrt.f32 %v301_v57  ;;  %v256_v6 = vpop.xlane.xlu1 %255 }
  0xc8   : > { %v253_v62 = vpop.xlane.xlu0 %252  ;;  %v708_v63 = vpop.eup %707  ;;  %519 = vst.msk [vmem:[%s972_s16 + $0x34] sm:$0xf] %vm505_vm1, %v650_v2  ;;  %v360_v34 = vmul.f32 %v706_v60, %v858_v40  ;;  %v304_v5 = vmax.f32 %v256_v6, 1e-24 }
  0xc9   : > { %v303_v7 = vmax.f32 %v253_v62, 1e-24  ;;  %518 = vst.msk [vmem:[%s972_s16 + $0x30] sm:$0xf] %vm505_vm1, %v649_v61  ;;  %v359_v35 = vmul.f32 %v708_v63, %v861_v41 }
  0xca   : > { %v652_v10 = vpack.c.bf16 %v360_v34, %v360_v34  ;;  %721 = vrsqrt.f32 %v304_v5 }
  0xcb   : > { %v710_v11 = vpop.eup %709  ;;  %v651_v8 = vpack.c.bf16 %v359_v35, %v359_v35  ;;  %723 = vrsqrt.f32 %v303_v7  ;;  %v262_v14 = vpop.xlane.xlu1 %261 }
  0xcc   : > { %v259_v15 = vpop.xlane.xlu0 %258  ;;  %v712_v9 = vpop.eup %711  ;;  %521 = vst.msk [vmem:[%s972_s16 + $0x3c] sm:$0xf] %vm505_vm1, %v652_v10  ;;  %v362_v40 = vmul.f32 %v710_v11, %v870_v46  ;;  %v306_v18 = vmax.f32 %v262_v14, 1e-24 }
  0xcd   : > { %v305_v19 = vmax.f32 %v259_v15, 1e-24  ;;  %520 = vst.msk [vmem:[%s972_s16 + $0x38] sm:$0xf] %vm505_vm1, %v651_v8  ;;  %v361_v41 = vmul.f32 %v712_v9, %v873_v47 }
  0xce   : > { %v654_v24 = vpack.c.bf16 %v362_v40, %v362_v40  ;;  %725 = vrsqrt.f32 %v306_v18 }
  0xcf   : > { %v714_v25 = vpop.eup %713  ;;  %v653_v26 = vpack.c.bf16 %v361_v41, %v361_v41  ;;  %727 = vrsqrt.f32 %v305_v19  ;;  %v268_v27 = vpop.xlane.xlu1 %267 }
  0xd0   : > { %v265_v16 = vpop.xlane.xlu0 %264  ;;  %v716_v32 = vpop.eup %715  ;;  %523 = vst.msk [vmem:[%s972_s16 + $0x44] sm:$0xf] %vm505_vm1, %v654_v24  ;;  %v364_v46 = vmul.f32 %v714_v25, %v882_v52  ;;  %v308_v33 = vmax.f32 %v268_v27, 1e-24 }
  0xd1   : > { %v307_v17 = vmax.f32 %v265_v16, 1e-24  ;;  %522 = vst.msk [vmem:[%s972_s16 + $0x40] sm:$0xf] %vm505_vm1, %v653_v26  ;;  %v363_v47 = vmul.f32 %v716_v32, %v885_v53 }
  0xd2   : > { %v656_v36 = vpack.c.bf16 %v364_v46, %v364_v46  ;;  %729 = vrsqrt.f32 %v308_v33 }
  0xd3   : > { %v718_v37 = vpop.eup %717  ;;  %v655_v42 = vpack.c.bf16 %v363_v47, %v363_v47  ;;  %731 = vrsqrt.f32 %v307_v17  ;;  %v274_v43 = vpop.xlane.xlu1 %273 }
  0xd4   : > { %v271_v44 = vpop.xlane.xlu0 %270  ;;  %v720_v0 = vpop.eup %719  ;;  %525 = vst.msk [vmem:[%s972_s16 + $0x4c] sm:$0xf] %vm505_vm1, %v656_v36  ;;  %v366_v52 = vmul.f32 %v718_v37, %v894_v58  ;;  %v310_v22 = vmax.f32 %v274_v43, 1e-24 }
  0xd5   : > { %v309_v45 = vmax.f32 %v271_v44, 1e-24  ;;  %524 = vst.msk [vmem:[%s972_s16 + $0x48] sm:$0xf] %vm505_vm1, %v655_v42  ;;  %v365_v53 = vmul.f32 %v720_v0, %v897_v59 }
  0xd6   : > { %v658_v48 = vpack.c.bf16 %v366_v52, %v366_v52  ;;  %733 = vrsqrt.f32 %v310_v22 }
  0xd7   : > { %v722_v23 = vpop.eup %721  ;;  %v657_v49 = vpack.c.bf16 %v365_v53, %v365_v53  ;;  %735 = vrsqrt.f32 %v309_v45  ;;  %v280_v1 = vpop.xlane.xlu1 %279 }
  0xd8   : > { %v277_v50 = vpop.xlane.xlu0 %276  ;;  %v724_v51 = vpop.eup %723  ;;  %527 = vst.msk [vmem:[%s972_s16 + $0x54] sm:$0xf] %vm505_vm1, %v658_v48  ;;  %v368_v58 = vmul.f32 %v722_v23, %v906_v3  ;;  %v312_v54 = vmax.f32 %v280_v1, 1e-24 }
  0xd9   : > { %v311_v55 = vmax.f32 %v277_v50, 1e-24  ;;  %526 = vst.msk [vmem:[%s972_s16 + $0x50] sm:$0xf] %vm505_vm1, %v657_v49  ;;  %v367_v59 = vmul.f32 %v724_v51, %v909_v4 }
  0xda   : > { %v660_v28 = vpack.c.bf16 %v368_v58, %v368_v58  ;;  %737 = vrsqrt.f32 %v312_v54 }
  0xdb   : > { %v726_v56 = vpop.eup %725  ;;  %v659_v57 = vpack.c.bf16 %v367_v59, %v367_v59  ;;  %739 = vrsqrt.f32 %v311_v55 }
  0xdc   : > { %v728_v29 = vpop.eup %727  ;;  %529 = vst.msk [vmem:[%s972_s16 + $0x5c] sm:$0xf] %vm505_vm1, %v660_v28  ;;  %v370_v2 = vmul.f32 %v726_v56, %v918_v12 }
  0xdd   : > { %528 = vst.msk [vmem:[%s972_s16 + $0x58] sm:$0xf] %vm505_vm1, %v659_v57  ;;  %v369_v3 = vmul.f32 %v728_v29, %v921_v13 }
  0xde   : > { %v662_v60 = vpack.c.bf16 %v370_v2, %v370_v2 }
  0xdf   : > { %v730_v61 = vpop.eup %729  ;;  %v661_v4 = vpack.c.bf16 %v369_v3, %v369_v3 }
  0xe0   : > { %v732_v6 = vpop.eup %731  ;;  %531 = vst.msk [vmem:[%s972_s16 + $0x64] sm:$0xf] %vm505_vm1, %v662_v60  ;;  %v372_v62 = vmul.f32 %v730_v61, %v930_v20 }
  0xe1   : > { %530 = vst.msk [vmem:[%s972_s16 + $0x60] sm:$0xf] %vm505_vm1, %v661_v4  ;;  %v371_v63 = vmul.f32 %v732_v6, %v933_v21 }
  0xe2   : > { %v664_v12 = vpack.c.bf16 %v372_v62, %v372_v62 }
  0xe3   : > { %v734_v34 = vpop.eup %733  ;;  %v663_v5 = vpack.c.bf16 %v371_v63, %v371_v63 }
  0xe4   : > { %v736_v7 = vpop.eup %735  ;;  %533 = vst.msk [vmem:[%s972_s16 + $0x6c] sm:$0xf] %vm505_vm1, %v664_v12  ;;  %v374_v13 = vmul.f32 %v734_v34, %v942_v30 }
  0xe5   : > { %532 = vst.msk [vmem:[%s972_s16 + $0x68] sm:$0xf] %vm505_vm1, %v663_v5  ;;  %v373_v35 = vmul.f32 %v736_v7, %v945_v31 }
  0xe6   : > { %v666_v20 = vpack.c.bf16 %v374_v13, %v374_v13 }
  0xe7   : > { %v738_v10 = vpop.eup %737  ;;  %v665_v11 = vpack.c.bf16 %v373_v35, %v373_v35 }
  0xe8   : > { %v740_v8 = vpop.eup %739  ;;  %535 = vst.msk [vmem:[%s972_s16 + $0x74] sm:$0xf] %vm505_vm1, %v666_v20  ;;  %v376_v21 = vmul.f32 %v738_v10, %v954_v38 }
  0xe9   : > { %534 = vst.msk [vmem:[%s972_s16 + $0x70] sm:$0xf] %vm505_vm1, %v665_v11  ;;  %v375_v14 = vmul.f32 %v740_v8, %v957_v39 }
  0xea   : > { %v668_v15 = vpack.c.bf16 %v376_v21, %v376_v21 }
  0xeb   : > { %v667_v9 = vpack.c.bf16 %v375_v14, %v375_v14 }
  0xec   : > { %537 = vst.msk [vmem:[%s972_s16 + $0x7c] sm:$0xf] %vm505_vm1, %v668_v15 }
  0xed   : > { %536 = vst.msk [vmem:[%s972_s16 + $0x78] sm:$0xf] %vm505_vm1, %v667_v9 }
  0xee PF: > { %s11_s6 = sadd.s32 1, %s747_s6  }
  0xef   : > { %p8_p4 = scmp.ge.s32.totalorder %s11_s6, 4  }
  0xf1   :  { %10 = sbr.rel (!%p8_p4) target bundleno = 1 (0x1), region = 54 }

</bundles_post_ra>
